<compile_context>
chip_gen: v6e
topology: v6e:2x2x1
jax: 0.10.0
libtpu: 0.0.40
codegen_flags: <defaults>
</compile_context>

<pallas_src>
import functools

import jax
import jax.numpy as jnp
from jax import lax
from jax.experimental import pallas as pl
from jax.experimental.pallas import tpu as pltpu

K = 7                       # Conv1d kernel size
PAD = (K - 1) // 2          # zero padding = 3
_LANE = 128                 # TPU lane width
_MAX_CARRY_ELEMS = 8 * 1024         # cap Bb*L so (Bb, L) f32 pooled carries stay in vregs
_STATIC_UNROLL_MAX = 16             # fully unroll channel loops up to this many chunks


# ---------------------------------------------------------------------------
# small static helpers (trace-time only)
# ---------------------------------------------------------------------------
def _round_up(n, m):
    return ((n + m - 1) // m) * m


def _largest_divisor(n, cap):
    cap = max(1, min(n, cap))
    for d in range(cap, 0, -1):
        if n % d == 0:
            return d
    return 1


def _channel_chunks(C, itemsize):
    # One packed sublane tile per chunk: 8 rows f32, 16 rows bf16, 32 rows int8.
    pack_rows = max(8, 32 // max(1, itemsize))
    cch = min(C, pack_rows)
    return cch, C // cch, C % cch


@functools.lru_cache(maxsize=1)
def _hw_defaults():
    """(vmem_limit_bytes, num_tensorcores) - generation aware, with safe fallbacks."""
    vmem_cap = 64 * 1024 * 1024      # assume the smallest (v7x) VMEM if the query fails
    num_tc = 1
    try:
        info = pltpu.get_tpu_info()
        vmem_cap = int(getattr(info, "vmem_capacity_bytes", vmem_cap))
        for name in ("num_tensorcores", "tensorcores_per_chip", "num_cores"):
            val = getattr(info, name, None)
            if val:
                num_tc = int(val)
                break
    except Exception:                # non-TPU host / older jax: conservative defaults
        pass
    vmem_limit = min((vmem_cap * 3) // 4, 96 * 1024 * 1024)
    return vmem_limit, max(1, num_tc)


# ---------------------------------------------------------------------------
# in-kernel building blocks
# ---------------------------------------------------------------------------
def _pooled_rows(x_ref, cch, n_full, c_tail):
    """Mean/max over channels, in fixed sublane-tile chunks so the full (C, L) slab is
    never live in vregs.  Returns (avg, max) as (Bb, L) float32."""
    bb, c_total, lanes = x_ref.shape
    s_acc = jnp.zeros((bb, lanes), jnp.float32)
    m_acc = jnp.full((bb, lanes), -jnp.inf, jnp.float32)

    def step(c0, s_acc, m_acc):
        xc = x_ref[:, pl.ds(c0, cch), :].astype(jnp.float32)      # (bb, cch, lanes)
        return (s_acc + jnp.sum(xc, axis=1),
                jnp.maximum(m_acc, jnp.max(xc, axis=1)))

    if n_full > 0:
        if n_full <= _STATIC_UNROLL_MAX:
            for i in range(n_full):                               # static offsets
                s_acc, m_acc = step(i * cch, s_acc, m_acc)
        else:
            def body(i, carry):
                s, m = carry
                return step(pl.multiple_of(i * cch, cch), s, m)
            s_acc, m_acc = lax.fori_loop(0, n_full, body, (s_acc, m_acc), unroll=8)
    if c_tail > 0:                                                # static tail chunk
        xt = x_ref[:, pl.ds(n_full * cch, c_tail), :].astype(jnp.float32)
        s_acc = s_acc + jnp.sum(xt, axis=1)
        m_acc = jnp.maximum(m_acc, jnp.max(xt, axis=1))
    return s_acc * (1.0 / c_total), m_acc


def _conv_sigmoid(avg, mx, w_ref):
    """Conv1d(2->1, k=7, pad=3, bias=False) + sigmoid over full-length pooled rows.
    avg/mx: (Bb, L) f32; w_ref: (2*K,) SMEM ([avg taps | max taps])."""
    bb, lanes = avg.shape
    lane = lax.broadcasted_iota(jnp.int32, (1, lanes), 1)
    acc = jnp.zeros((bb, lanes), jnp.float32)
    for k in range(K):                                            # 7 taps, unrolled
        s = k - PAD                                               # tap offset in [-3, 3]
        if s == 0:
            a_sh, m_sh = avg, mx
        else:
            a_sh = pltpu.roll(avg, shift=(-s) % lanes, axis=1)
            m_sh = pltpu.roll(mx, shift=(-s) % lanes, axis=1)
        tap = w_ref[k] * a_sh + w_ref[K + k] * m_sh               # (bb, lanes)
        if s == 0:
            acc = acc + tap
        else:
            valid = (lane + s >= 0) & (lane + s < lanes)          # Conv1d zero padding
            acc = acc + jnp.where(valid, tap, 0.0)
    return jax.nn.sigmoid(acc)


def _apply_gate(x_ref, o_ref, attn, cch, n_full, c_tail):
    """out = x * attn (broadcast over channels), C-chunked to bound vreg liveness."""
    gate = attn[:, None, :]

    def step(c0, width):
        xc = x_ref[:, pl.ds(c0, width), :].astype(jnp.float32)
        o_ref[:, pl.ds(c0, width), :] = (xc * gate).astype(o_ref.dtype)

    if n_full > 0:
        if n_full <= _STATIC_UNROLL_MAX:
            for i in range(n_full):
                step(i * cch, cch)
        else:
            def body(i, carry):
                step(pl.multiple_of(i * cch, cch), cch)
                return carry
            lax.fori_loop(0, n_full, body, 0, unroll=8)
    if c_tail > 0:
        step(n_full * cch, c_tail)


# ---------------------------------------------------------------------------
# kernels
# ---------------------------------------------------------------------------
def _fused_kernel(x_ref, w_ref, o_ref, *, cch, n_full, c_tail):
    # x_ref/o_ref: (Bb, C, Lp); w_ref: (2K,) SMEM.  Full L in one block, so the
    # masked cyclic roll is exactly Conv1d zero padding.
    avg, mx = _pooled_rows(x_ref, cch, n_full, c_tail)
    attn = _conv_sigmoid(avg, mx, w_ref)                          # (Bb, Lp) f32
    _apply_gate(x_ref, o_ref, attn, cch, n_full, c_tail)


def _pool_kernel(x_ref, p_ref, *, cch, n_full, c_tail):
    # x_ref: (Bb, C, LT) -> p_ref: (Bb, 2, LT) f32 (row 0 = mean, row 1 = max)
    avg, mx = _pooled_rows(x_ref, cch, n_full, c_tail)
    p_ref[:, 0:1, :] = avg[:, None, :]
    p_ref[:, 1:2, :] = mx[:, None, :]


def _gate_kernel(a_ref, x_ref, o_ref, *, cch, n_full, c_tail):
    # a_ref: (Bb, 1, LT) precomputed attention tile; pure streaming multiply.
    attn = a_ref[:, 0, :].astype(jnp.float32)                     # (Bb, LT)
    _apply_gate(x_ref, o_ref, attn, cch, n_full, c_tail)


# ---------------------------------------------------------------------------
# wrappers
# ---------------------------------------------------------------------------
def _fused_path(x, w_flat, block_budget, vmem_limit, num_tc):
    B, C, Lp = x.shape
    itemsize = x.dtype.itemsize
    per_batch = C * Lp * itemsize
    # Force >=2 grid steps only on 2-TensorCore chips (v7x); on 1-TC chips extra
    # steps are pure overhead with smaller tiles.
    bb_cap = B if (B == 1 or num_tc < 2) else B - 1
    bb_cap = min(bb_cap,
                 max(1, block_budget // per_batch),
                 max(1, _MAX_CARRY_ELEMS // Lp))
    Bb = _largest_divisor(B, bb_cap)
    cch, n_full, c_tail = _channel_chunks(C, itemsize)

    kernel = functools.partial(_fused_kernel, cch=cch, n_full=n_full, c_tail=c_tail)
    cost = pl.CostEstimate(flops=2 * B * C * Lp + 4 * K * B * Lp,
                           transcendentals=B * Lp,
                           bytes_accessed=2 * B * C * Lp * itemsize + 2 * K * 4)
    return pl.pallas_call(
        kernel,
        out_shape=jax.ShapeDtypeStruct((B, C, Lp), x.dtype),
        grid=(B // Bb,),
        in_specs=[
            pl.BlockSpec((Bb, C, Lp), lambda b: (b, 0, 0)),
            pl.BlockSpec(memory_space=pltpu.MemorySpace.SMEM),
        ],
        out_specs=pl.BlockSpec((Bb, C, Lp), lambda b: (b, 0, 0)),
        compiler_params=pltpu.CompilerParams(
            dimension_semantics=("parallel",),
            vmem_limit_bytes=vmem_limit),
        cost_estimate=cost,
    )(x, w_flat)


def _two_pass_path(x, w_flat, block_budget, vmem_limit, num_tc):
    B, C, Lp = x.shape
    itemsize = x.dtype.itemsize

    # Largest L tile (multiple of 128, dividing Lp) whose x slab fits the per-step
    # budget and keeps the pooled-row carries (Bb*LT f32) inside the vreg cap.
    m = Lp // _LANE
    d = 1
    for cand in range(m, 0, -1):
        if (m % cand == 0 and cand * _LANE * C * itemsize <= block_budget
                and cand * _LANE <= _MAX_CARRY_ELEMS):
            d = cand
            break
    LT = d * _LANE
    # TODO(synk): also tile C across the grid if a single (1, C, 128) slab ever
    # exceeds the VMEM budget (extremely large channel counts).
    bb_cap = min(B,
                 max(1, block_budget // (C * LT * itemsize)),
                 max(1, _MAX_CARRY_ELEMS // LT))
    Bb = _largest_divisor(B, bb_cap)
    cch, n_full, c_tail = _channel_chunks(C, itemsize)
    nB, nL = B // Bb, Lp // LT

    # Pass 1 (Pallas): channel pooling -> (B, 2, Lp) f32 rows (mean, max).
    pool_kernel = functools.partial(_pool_kernel, cch=cch, n_full=n_full, c_tail=c_tail)
    pooled = pl.pallas_call(
        pool_kernel,
        out_shape=jax.ShapeDtypeStruct((B, 2, Lp), jnp.float32),
        grid=(nB, nL),
        in_specs=[pl.BlockSpec((Bb, C, LT), lambda b, l: (b, 0, l))],
        out_specs=pl.BlockSpec((Bb, 2, LT), lambda b, l: (b, 0, l)),
        compiler_params=pltpu.CompilerParams(
            dimension_semantics=("parallel", "parallel"),
            vmem_limit_bytes=vmem_limit),
        cost_estimate=pl.CostEstimate(
            flops=2 * B * C * Lp, transcendentals=0,
            bytes_accessed=B * C * Lp * itemsize + 2 * B * Lp * 4),
    )(x)

    # Hoisted conv + sigmoid, computed ONCE on the tiny (B, 2, Lp) pooled rows (plain
    # XLA on ~2/C of the input bytes) so pass 2 is a pure streaming gate multiply.
    w = w_flat.reshape(1, 2, K).astype(jnp.float32)
    attn = jax.nn.sigmoid(lax.conv_general_dilated(
        pooled, w, window_strides=(1,), padding=[(PAD, PAD)],
        dimension_numbers=("NCH", "OIH", "NCH")))                 # (B, 1, Lp) f32

    # Pass 2 (Pallas): out = x * attn, streamed at the HBM roofline.
    gate_kernel = functools.partial(_gate_kernel, cch=cch, n_full=n_full, c_tail=c_tail)
    return pl.pallas_call(
        gate_kernel,
        out_shape=jax.ShapeDtypeStruct((B, C, Lp), x.dtype),
        grid=(nB, nL),
        in_specs=[
            pl.BlockSpec((Bb, 1, LT), lambda b, l: (b, 0, l)),
            pl.BlockSpec((Bb, C, LT), lambda b, l: (b, 0, l)),
        ],
        out_specs=pl.BlockSpec((Bb, C, LT), lambda b, l: (b, 0, l)),
        compiler_params=pltpu.CompilerParams(
            dimension_semantics=("parallel", "parallel"),
            vmem_limit_bytes=vmem_limit),
        cost_estimate=pl.CostEstimate(
            flops=B * C * Lp, transcendentals=0,
            bytes_accessed=2 * B * C * Lp * itemsize + B * Lp * 4),
    )(attn, x)


def spatial_attention(x, w_flat, *, block_budget_bytes=None, vmem_limit_bytes=None,
                      num_tensorcores=None):
    """x: (B, C, L); w_flat: (2*K,) = Conv1d(2, 1, 7, bias=False).weight.reshape(-1).
    Returns x * sigmoid(conv1d([mean_c(x); max_c(x)])) with PyTorch NCL semantics."""
    B, C, L = x.shape
    itemsize = x.dtype.itemsize

    auto_vmem, auto_tc = _hw_defaults()
    vmem_limit = auto_vmem if vmem_limit_bytes is None else vmem_limit_bytes
    num_tc = auto_tc if num_tensorcores is None else num_tensorcores
    # in + out blocks are each double-buffered -> ~4 live copies; keep ~20% headroom.
    block_budget = (vmem_limit // 5) if block_budget_bytes is None else block_budget_bytes

    Lp = max(_LANE, _round_up(L, _LANE))                 # lane-dense, unmasked stores
    x_p = x if Lp == L else jnp.pad(x, ((0, 0), (0, 0), (0, Lp - L)))
    w_flat = w_flat.astype(jnp.float32)

    fused_ok = (C * Lp * itemsize <= block_budget) and (Lp <= _MAX_CARRY_ELEMS)
    if fused_ok and num_tc >= 2 and B == 1 and (Lp // _LANE) >= 2:
        fused_ok = False   # grid=(1,) would starve the 2nd TensorCore: give it an L axis
    if fused_ok:
        out = _fused_path(x_p, w_flat, block_budget, vmem_limit, num_tc)
    else:
        out = _two_pass_path(x_p, w_flat, block_budget, vmem_limit, num_tc)
    return out if Lp == L else out[:, :, :L]


# ---------------------------------------------------------------------------
# pure-JAX reference (mirrors the PyTorch module)
# ---------------------------------------------------------------------------
def reference_spatial_attention(x, w_flat):
    avg = jnp.mean(x, axis=1, keepdims=True)
    mx = jnp.max(x, axis=1, keepdims=True)
    concat = jnp.concatenate([avg, mx], axis=1)            # (B, 2, L)
    w = w_flat.reshape(1, 2, K)                            # (O, I, K)
    out = lax.conv_general_dilated(
        concat, w, window_strides=(1,), padding=[(PAD, PAD)],
        dimension_numbers=("NCH", "OIH", "NCH"))
    return x * jax.nn.sigmoid(out)


if __name__ == "__main__":
    key = jax.random.PRNGKey(0)
    kx, kw, kx2 = jax.random.split(key, 3)

    # Conv1d weight (out=1, in=2, k=7) flattened to (14,), PyTorch-style uniform init.
    bound = 1.0 / jnp.sqrt(2.0 * K)
    w_flat = jax.random.uniform(kw, (2 * K,), jnp.float32, -bound, bound)

    # --- Test 1: fused single-pass path (C=10 exercises the static channel tail;
    #             L=100 pads to Lp=128 for lane-dense stores) ----------------------
    B, C, L = 4, 10, 100
    x = jax.random.normal(kx, (B, C, L), jnp.float32)
    out = jax.block_until_ready(spatial_attention(x, w_flat))
    ref = reference_spatial_attention(x, w_flat)
    assert out.shape == x.shape
    assert jnp.allclose(out, ref, atol=1e-5, rtol=1e-5), "fused path mismatch"

    # --- Test 2: two-pass L-tiled fallback (forced via a tiny per-step block budget);
    #             hoisted attn + streaming gate over 3 L-tiles of 128 --------------
    B2, C2, L2 = 2, 16, 260
    x2 = jax.random.normal(kx2, (B2, C2, L2), jnp.float32)
    out2 = jax.block_until_ready(spatial_attention(x2, w_flat, block_budget_bytes=4096))
    ref2 = reference_spatial_attention(x2, w_flat)
    assert out2.shape == x2.shape
    assert jnp.allclose(out2, ref2, atol=1e-5, rtol=1e-5), "two-pass path mismatch"

    # --- Test 3: bf16 I/O (f32 accumulation inside) + 2-TensorCore grid splitting --
    xb = x.astype(jnp.bfloat16)
    outb = jax.block_until_ready(spatial_attention(xb, w_flat, num_tensorcores=2))
    refb = reference_spatial_attention(xb.astype(jnp.float32), w_flat)
    assert outb.dtype == jnp.bfloat16
    assert jnp.allclose(outb.astype(jnp.float32), refb, atol=5e-2, rtol=5e-2), \
        "bf16 path mismatch"

    print("KERNEL_OK")
</pallas_src>

<mosaic_0001>
module attributes {stable_mosaic.version = 11 : i64} {
  func.func @_fused_kernel(%arg0: i32, %arg1: memref<4x10x128xf32, #tpu.memory_space<vmem>>, %arg2: memref<14xf32, #tpu.memory_space<smem>>, %arg3: memref<4x10x128xf32, #tpu.memory_space<vmem>>) attributes {dimension_semantics = [#tpu.dimension_semantics<parallel>], iteration_bounds = array<i64: 1>, scalar_prefetch = 0 : i64, scratch_operands = 0 : i64, tpu.core_type = #tpu.core_type<tc>, window_params = [{transform_indices = @transform_0, window_bounds = array<i64: 4, 10, 128>}, {transform_indices = @transform_1, window_bounds = array<i64: 14>}, {transform_indices = @transform_2, window_bounds = array<i64: 4, 10, 128>}]} {
    %cst = arith.constant 0.000000e+00 : f32
    %0 = vector.broadcast %cst : f32 to vector<4x128xf32>
    %cst_0 = arith.constant 0xFF800000 : f32
    %1 = vector.broadcast %cst_0 : f32 to vector<4x128xf32>
    %c0 = arith.constant 0 : index
    %c0_1 = arith.constant 0 : index
    %c0_2 = arith.constant 0 : index
    %2 = vector.load %arg1[%c0, %c0_1, %c0_2] : memref<4x10x128xf32, #tpu.memory_space<vmem>>, vector<4x8x128xf32>
    %cst_3 = arith.constant dense<0.000000e+00> : vector<4x128xf32>
    %3 = vector.multi_reduction <add>, %2, %cst_3 [1] : vector<4x8x128xf32> to vector<4x128xf32>
    %4 = arith.addf %0, %3 : vector<4x128xf32>
    %cst_4 = arith.constant dense<0xFF800000> : vector<4x128xf32>
    %5 = vector.multi_reduction <maximumf>, %2, %cst_4 [1] : vector<4x8x128xf32> to vector<4x128xf32>
    %6 = arith.maximumf %1, %5 : vector<4x128xf32>
    %c0_5 = arith.constant 0 : index
    %c8 = arith.constant 8 : index
    %c0_6 = arith.constant 0 : index
    %7 = vector.load %arg1[%c0_5, %c8, %c0_6] : memref<4x10x128xf32, #tpu.memory_space<vmem>>, vector<4x2x128xf32>
    %cst_7 = arith.constant dense<0.000000e+00> : vector<4x128xf32>
    %8 = vector.multi_reduction <add>, %7, %cst_7 [1] : vector<4x2x128xf32> to vector<4x128xf32>
    %9 = arith.addf %4, %8 : vector<4x128xf32>
    %cst_8 = arith.constant dense<0xFF800000> : vector<4x128xf32>
    %10 = vector.multi_reduction <maximumf>, %7, %cst_8 [1] : vector<4x2x128xf32> to vector<4x128xf32>
    %11 = arith.maximumf %6, %10 : vector<4x128xf32>
    %cst_9 = arith.constant 1.000000e-01 : f32
    %12 = vector.broadcast %cst_9 : f32 to vector<4x128xf32>
    %13 = arith.mulf %9, %12 : vector<4x128xf32>
    %14 = tpu.iota {dimensions = array<i32: 1>} : vector<1x128xi32>
    %cst_10 = arith.constant 0.000000e+00 : f32
    %15 = vector.broadcast %cst_10 : f32 to vector<4x128xf32>
    %c3_i32 = arith.constant 3 : i32
    %16 = tpu.dynamic_rotate %13 by %c3_i32 dim 1 : vector<4x128xf32>, i32 -> vector<4x128xf32>
    %c3_i32_11 = arith.constant 3 : i32
    %17 = tpu.dynamic_rotate %11 by %c3_i32_11 dim 1 : vector<4x128xf32>, i32 -> vector<4x128xf32>
    %c0_12 = arith.constant 0 : index
    %18 = memref.load %arg2[%c0_12] : memref<14xf32, #tpu.memory_space<smem>>
    %19 = vector.broadcast %18 : f32 to vector<4x128xf32>
    %20 = arith.mulf %19, %16 : vector<4x128xf32>
    %c7 = arith.constant 7 : index
    %21 = memref.load %arg2[%c7] : memref<14xf32, #tpu.memory_space<smem>>
    %22 = vector.broadcast %21 : f32 to vector<4x128xf32>
    %23 = arith.mulf %22, %17 : vector<4x128xf32>
    %24 = arith.addf %20, %23 : vector<4x128xf32>
    %c-3_i32 = arith.constant -3 : i32
    %25 = vector.broadcast %c-3_i32 : i32 to vector<1x128xi32>
    %26 = arith.addi %14, %25 : vector<1x128xi32>
    %c0_i32 = arith.constant 0 : i32
    %27 = vector.broadcast %c0_i32 : i32 to vector<1x128xi32>
    %28 = arith.cmpi sge, %26, %27 : vector<1x128xi32>
    %c-3_i32_13 = arith.constant -3 : i32
    %29 = vector.broadcast %c-3_i32_13 : i32 to vector<1x128xi32>
    %30 = arith.addi %14, %29 : vector<1x128xi32>
    %c128_i32 = arith.constant 128 : i32
    %31 = vector.broadcast %c128_i32 : i32 to vector<1x128xi32>
    %32 = arith.cmpi slt, %30, %31 : vector<1x128xi32>
    %33 = arith.andi %28, %32 : vector<1x128xi1>
    %cst_14 = arith.constant 0.000000e+00 : f32
    %34 = vector.shape_cast %33 : vector<1x128xi1> to vector<1x128xi1>
    %35 = vector.broadcast %34 : vector<1x128xi1> to vector<4x128xi1>
    %36 = vector.broadcast %cst_14 : f32 to vector<4x128xf32>
    %37 = arith.select %35, %24, %36 : vector<4x128xi1>, vector<4x128xf32>
    %38 = arith.addf %15, %37 : vector<4x128xf32>
    %c2_i32 = arith.constant 2 : i32
    %39 = tpu.dynamic_rotate %13 by %c2_i32 dim 1 : vector<4x128xf32>, i32 -> vector<4x128xf32>
    %c2_i32_15 = arith.constant 2 : i32
    %40 = tpu.dynamic_rotate %11 by %c2_i32_15 dim 1 : vector<4x128xf32>, i32 -> vector<4x128xf32>
    %c1 = arith.constant 1 : index
    %41 = memref.load %arg2[%c1] : memref<14xf32, #tpu.memory_space<smem>>
    %42 = vector.broadcast %41 : f32 to vector<4x128xf32>
    %43 = arith.mulf %42, %39 : vector<4x128xf32>
    %c8_16 = arith.constant 8 : index
    %44 = memref.load %arg2[%c8_16] : memref<14xf32, #tpu.memory_space<smem>>
    %45 = vector.broadcast %44 : f32 to vector<4x128xf32>
    %46 = arith.mulf %45, %40 : vector<4x128xf32>
    %47 = arith.addf %43, %46 : vector<4x128xf32>
    %c-2_i32 = arith.constant -2 : i32
    %48 = vector.broadcast %c-2_i32 : i32 to vector<1x128xi32>
    %49 = arith.addi %14, %48 : vector<1x128xi32>
    %c0_i32_17 = arith.constant 0 : i32
    %50 = vector.broadcast %c0_i32_17 : i32 to vector<1x128xi32>
    %51 = arith.cmpi sge, %49, %50 : vector<1x128xi32>
    %c-2_i32_18 = arith.constant -2 : i32
    %52 = vector.broadcast %c-2_i32_18 : i32 to vector<1x128xi32>
    %53 = arith.addi %14, %52 : vector<1x128xi32>
    %c128_i32_19 = arith.constant 128 : i32
    %54 = vector.broadcast %c128_i32_19 : i32 to vector<1x128xi32>
    %55 = arith.cmpi slt, %53, %54 : vector<1x128xi32>
    %56 = arith.andi %51, %55 : vector<1x128xi1>
    %cst_20 = arith.constant 0.000000e+00 : f32
    %57 = vector.shape_cast %56 : vector<1x128xi1> to vector<1x128xi1>
    %58 = vector.broadcast %57 : vector<1x128xi1> to vector<4x128xi1>
    %59 = vector.broadcast %cst_20 : f32 to vector<4x128xf32>
    %60 = arith.select %58, %47, %59 : vector<4x128xi1>, vector<4x128xf32>
    %61 = arith.addf %38, %60 : vector<4x128xf32>
    %c1_i32 = arith.constant 1 : i32
    %62 = tpu.dynamic_rotate %13 by %c1_i32 dim 1 : vector<4x128xf32>, i32 -> vector<4x128xf32>
    %c1_i32_21 = arith.constant 1 : i32
    %63 = tpu.dynamic_rotate %11 by %c1_i32_21 dim 1 : vector<4x128xf32>, i32 -> vector<4x128xf32>
    %c2 = arith.constant 2 : index
    %64 = memref.load %arg2[%c2] : memref<14xf32, #tpu.memory_space<smem>>
    %65 = vector.broadcast %64 : f32 to vector<4x128xf32>
    %66 = arith.mulf %65, %62 : vector<4x128xf32>
    %c9 = arith.constant 9 : index
    %67 = memref.load %arg2[%c9] : memref<14xf32, #tpu.memory_space<smem>>
    %68 = vector.broadcast %67 : f32 to vector<4x128xf32>
    %69 = arith.mulf %68, %63 : vector<4x128xf32>
    %70 = arith.addf %66, %69 : vector<4x128xf32>
    %c-1_i32 = arith.constant -1 : i32
    %71 = vector.broadcast %c-1_i32 : i32 to vector<1x128xi32>
    %72 = arith.addi %14, %71 : vector<1x128xi32>
    %c0_i32_22 = arith.constant 0 : i32
    %73 = vector.broadcast %c0_i32_22 : i32 to vector<1x128xi32>
    %74 = arith.cmpi sge, %72, %73 : vector<1x128xi32>
    %c-1_i32_23 = arith.constant -1 : i32
    %75 = vector.broadcast %c-1_i32_23 : i32 to vector<1x128xi32>
    %76 = arith.addi %14, %75 : vector<1x128xi32>
    %c128_i32_24 = arith.constant 128 : i32
    %77 = vector.broadcast %c128_i32_24 : i32 to vector<1x128xi32>
    %78 = arith.cmpi slt, %76, %77 : vector<1x128xi32>
    %79 = arith.andi %74, %78 : vector<1x128xi1>
    %cst_25 = arith.constant 0.000000e+00 : f32
    %80 = vector.shape_cast %79 : vector<1x128xi1> to vector<1x128xi1>
    %81 = vector.broadcast %80 : vector<1x128xi1> to vector<4x128xi1>
    %82 = vector.broadcast %cst_25 : f32 to vector<4x128xf32>
    %83 = arith.select %81, %70, %82 : vector<4x128xi1>, vector<4x128xf32>
    %84 = arith.addf %61, %83 : vector<4x128xf32>
    %c3 = arith.constant 3 : index
    %85 = memref.load %arg2[%c3] : memref<14xf32, #tpu.memory_space<smem>>
    %86 = vector.broadcast %85 : f32 to vector<4x128xf32>
    %87 = arith.mulf %86, %13 : vector<4x128xf32>
    %c10 = arith.constant 10 : index
    %88 = memref.load %arg2[%c10] : memref<14xf32, #tpu.memory_space<smem>>
    %89 = vector.broadcast %88 : f32 to vector<4x128xf32>
    %90 = arith.mulf %89, %11 : vector<4x128xf32>
    %91 = arith.addf %87, %90 : vector<4x128xf32>
    %92 = arith.addf %84, %91 : vector<4x128xf32>
    %c127_i32 = arith.constant 127 : i32
    %93 = tpu.dynamic_rotate %13 by %c127_i32 dim 1 : vector<4x128xf32>, i32 -> vector<4x128xf32>
    %c127_i32_26 = arith.constant 127 : i32
    %94 = tpu.dynamic_rotate %11 by %c127_i32_26 dim 1 : vector<4x128xf32>, i32 -> vector<4x128xf32>
    %c4 = arith.constant 4 : index
    %95 = memref.load %arg2[%c4] : memref<14xf32, #tpu.memory_space<smem>>
    %96 = vector.broadcast %95 : f32 to vector<4x128xf32>
    %97 = arith.mulf %96, %93 : vector<4x128xf32>
    %c11 = arith.constant 11 : index
    %98 = memref.load %arg2[%c11] : memref<14xf32, #tpu.memory_space<smem>>
    %99 = vector.broadcast %98 : f32 to vector<4x128xf32>
    %100 = arith.mulf %99, %94 : vector<4x128xf32>
    %101 = arith.addf %97, %100 : vector<4x128xf32>
    %c1_i32_27 = arith.constant 1 : i32
    %102 = vector.broadcast %c1_i32_27 : i32 to vector<1x128xi32>
    %103 = arith.addi %14, %102 : vector<1x128xi32>
    %c0_i32_28 = arith.constant 0 : i32
    %104 = vector.broadcast %c0_i32_28 : i32 to vector<1x128xi32>
    %105 = arith.cmpi sge, %103, %104 : vector<1x128xi32>
    %c1_i32_29 = arith.constant 1 : i32
    %106 = vector.broadcast %c1_i32_29 : i32 to vector<1x128xi32>
    %107 = arith.addi %14, %106 : vector<1x128xi32>
    %c128_i32_30 = arith.constant 128 : i32
    %108 = vector.broadcast %c128_i32_30 : i32 to vector<1x128xi32>
    %109 = arith.cmpi slt, %107, %108 : vector<1x128xi32>
    %110 = arith.andi %105, %109 : vector<1x128xi1>
    %cst_31 = arith.constant 0.000000e+00 : f32
    %111 = vector.shape_cast %110 : vector<1x128xi1> to vector<1x128xi1>
    %112 = vector.broadcast %111 : vector<1x128xi1> to vector<4x128xi1>
    %113 = vector.broadcast %cst_31 : f32 to vector<4x128xf32>
    %114 = arith.select %112, %101, %113 : vector<4x128xi1>, vector<4x128xf32>
    %115 = arith.addf %92, %114 : vector<4x128xf32>
    %c126_i32 = arith.constant 126 : i32
    %116 = tpu.dynamic_rotate %13 by %c126_i32 dim 1 : vector<4x128xf32>, i32 -> vector<4x128xf32>
    %c126_i32_32 = arith.constant 126 : i32
    %117 = tpu.dynamic_rotate %11 by %c126_i32_32 dim 1 : vector<4x128xf32>, i32 -> vector<4x128xf32>
    %c5 = arith.constant 5 : index
    %118 = memref.load %arg2[%c5] : memref<14xf32, #tpu.memory_space<smem>>
    %119 = vector.broadcast %118 : f32 to vector<4x128xf32>
    %120 = arith.mulf %119, %116 : vector<4x128xf32>
    %c12 = arith.constant 12 : index
    %121 = memref.load %arg2[%c12] : memref<14xf32, #tpu.memory_space<smem>>
    %122 = vector.broadcast %121 : f32 to vector<4x128xf32>
    %123 = arith.mulf %122, %117 : vector<4x128xf32>
    %124 = arith.addf %120, %123 : vector<4x128xf32>
    %c2_i32_33 = arith.constant 2 : i32
    %125 = vector.broadcast %c2_i32_33 : i32 to vector<1x128xi32>
    %126 = arith.addi %14, %125 : vector<1x128xi32>
    %c0_i32_34 = arith.constant 0 : i32
    %127 = vector.broadcast %c0_i32_34 : i32 to vector<1x128xi32>
    %128 = arith.cmpi sge, %126, %127 : vector<1x128xi32>
    %c2_i32_35 = arith.constant 2 : i32
    %129 = vector.broadcast %c2_i32_35 : i32 to vector<1x128xi32>
    %130 = arith.addi %14, %129 : vector<1x128xi32>
    %c128_i32_36 = arith.constant 128 : i32
    %131 = vector.broadcast %c128_i32_36 : i32 to vector<1x128xi32>
    %132 = arith.cmpi slt, %130, %131 : vector<1x128xi32>
    %133 = arith.andi %128, %132 : vector<1x128xi1>
    %cst_37 = arith.constant 0.000000e+00 : f32
    %134 = vector.shape_cast %133 : vector<1x128xi1> to vector<1x128xi1>
    %135 = vector.broadcast %134 : vector<1x128xi1> to vector<4x128xi1>
    %136 = vector.broadcast %cst_37 : f32 to vector<4x128xf32>
    %137 = arith.select %135, %124, %136 : vector<4x128xi1>, vector<4x128xf32>
    %138 = arith.addf %115, %137 : vector<4x128xf32>
    %c125_i32 = arith.constant 125 : i32
    %139 = tpu.dynamic_rotate %13 by %c125_i32 dim 1 : vector<4x128xf32>, i32 -> vector<4x128xf32>
    %c125_i32_38 = arith.constant 125 : i32
    %140 = tpu.dynamic_rotate %11 by %c125_i32_38 dim 1 : vector<4x128xf32>, i32 -> vector<4x128xf32>
    %c6 = arith.constant 6 : index
    %141 = memref.load %arg2[%c6] : memref<14xf32, #tpu.memory_space<smem>>
    %142 = vector.broadcast %141 : f32 to vector<4x128xf32>
    %143 = arith.mulf %142, %139 : vector<4x128xf32>
    %c13 = arith.constant 13 : index
    %144 = memref.load %arg2[%c13] : memref<14xf32, #tpu.memory_space<smem>>
    %145 = vector.broadcast %144 : f32 to vector<4x128xf32>
    %146 = arith.mulf %145, %140 : vector<4x128xf32>
    %147 = arith.addf %143, %146 : vector<4x128xf32>
    %c3_i32_39 = arith.constant 3 : i32
    %148 = vector.broadcast %c3_i32_39 : i32 to vector<1x128xi32>
    %149 = arith.addi %14, %148 : vector<1x128xi32>
    %c0_i32_40 = arith.constant 0 : i32
    %150 = vector.broadcast %c0_i32_40 : i32 to vector<1x128xi32>
    %151 = arith.cmpi sge, %149, %150 : vector<1x128xi32>
    %c3_i32_41 = arith.constant 3 : i32
    %152 = vector.broadcast %c3_i32_41 : i32 to vector<1x128xi32>
    %153 = arith.addi %14, %152 : vector<1x128xi32>
    %c128_i32_42 = arith.constant 128 : i32
    %154 = vector.broadcast %c128_i32_42 : i32 to vector<1x128xi32>
    %155 = arith.cmpi slt, %153, %154 : vector<1x128xi32>
    %156 = arith.andi %151, %155 : vector<1x128xi1>
    %cst_43 = arith.constant 0.000000e+00 : f32
    %157 = vector.shape_cast %156 : vector<1x128xi1> to vector<1x128xi1>
    %158 = vector.broadcast %157 : vector<1x128xi1> to vector<4x128xi1>
    %159 = vector.broadcast %cst_43 : f32 to vector<4x128xf32>
    %160 = arith.select %158, %147, %159 : vector<4x128xi1>, vector<4x128xf32>
    %161 = arith.addf %138, %160 : vector<4x128xf32>
    %162 = arith.negf %161 : vector<4x128xf32>
    %163 = math.exp %162 : vector<4x128xf32>
    %cst_44 = arith.constant 1.000000e+00 : f32
    %164 = vector.broadcast %cst_44 : f32 to vector<4x128xf32>
    %165 = arith.addf %164, %163 : vector<4x128xf32>
    %166 = arith.divf %164, %165 : vector<4x128xf32>
    %167 = vector.shape_cast %166 : vector<4x128xf32> to vector<4x1x128xf32>
    %c0_45 = arith.constant 0 : index
    %c0_46 = arith.constant 0 : index
    %c0_47 = arith.constant 0 : index
    %168 = vector.load %arg1[%c0_45, %c0_46, %c0_47] : memref<4x10x128xf32, #tpu.memory_space<vmem>>, vector<4x8x128xf32>
    %169 = vector.broadcast %167 : vector<4x1x128xf32> to vector<4x8x128xf32>
    %170 = arith.mulf %168, %169 : vector<4x8x128xf32>
    %c0_48 = arith.constant 0 : index
    %c0_49 = arith.constant 0 : index
    %c0_50 = arith.constant 0 : index
    %171 = vector.load %arg3[%c0_48, %c0_49, %c0_50] : memref<4x10x128xf32, #tpu.memory_space<vmem>>, vector<4x8x128xf32>
    tpu.vector_store %arg3[%c0_48, %c0_49, %c0_50], %170 {strides = array<i32>} : memref<4x10x128xf32, #tpu.memory_space<vmem>>, vector<4x8x128xf32>,
    %c0_51 = arith.constant 0 : index
    %c8_52 = arith.constant 8 : index
    %c0_53 = arith.constant 0 : index
    %172 = vector.load %arg1[%c0_51, %c8_52, %c0_53] : memref<4x10x128xf32, #tpu.memory_space<vmem>>, vector<4x2x128xf32>
    %173 = vector.broadcast %167 : vector<4x1x128xf32> to vector<4x2x128xf32>
    %174 = arith.mulf %172, %173 : vector<4x2x128xf32>
    %c0_54 = arith.constant 0 : index
    %c8_55 = arith.constant 8 : index
    %c0_56 = arith.constant 0 : index
    %175 = vector.load %arg3[%c0_54, %c8_55, %c0_56] : memref<4x10x128xf32, #tpu.memory_space<vmem>>, vector<4x2x128xf32>
    tpu.vector_store %arg3[%c0_54, %c8_55, %c0_56], %174 {strides = array<i32>} : memref<4x10x128xf32, #tpu.memory_space<vmem>>, vector<4x2x128xf32>,
    return
  }
  func.func @transform_0(%arg0: i32) -> (i32, i32, i32) {
    %c0_i32 = arith.constant 0 : i32
    %c0_i32_0 = arith.constant 0 : i32
    %c0_i32_1 = arith.constant 0 : i32
    return %arg0, %c0_i32, %c0_i32_0 : i32, i32, i32
  }
  func.func @transform_1(%arg0: i32) -> i32 {
    %c0_i32 = arith.constant 0 : i32
    %c0_i32_0 = arith.constant 0 : i32
    return %c0_i32 : i32
  }
  func.func @transform_2(%arg0: i32) -> (i32, i32, i32) {
    %c0_i32 = arith.constant 0 : i32
    %c0_i32_0 = arith.constant 0 : i32
    %c0_i32_1 = arith.constant 0 : i32
    return %arg0, %c0_i32, %c0_i32_0 : i32, i32, i32
  }
}

</mosaic_0001>

<bundles_post_ra>
// kernel: tpu_custom_call.1
= control target key start
LH: loop header
LB: loop body
LE: loop exit
PB: predicated region body
PF: predicated region fallthrough
CT: control target
= control target key end

     0   :  { %7 = vsyncpa [#allocation3], 0  ;;  %s624_s0 = inlined_call_operand.vmem [shape: f32[4,10,128], index: 0, kind: input, shape index: {}]   ;;  %s625_s1 = inlined_call_operand.vmem [shape: f32[14], index: 1, kind: input, shape index: {}]   ;;  %s626_s2 = inlined_call_operand.vmem [shape: f32[4,10,128], index: 2, kind: output, shape index: {}]  }
   0x1   :  { %s16_s11 = sshll.u32 %s625_s1, 4  ;;  %s17_s11 = int_to_ptr.vmem [resolvable:$true] %s16_s11 }
   0x2   :  { %s415_s12 = scalar_lea.vmem %s17_s11, 16  ;;  %p420_p1 = scmp.lt.s32.totalorder %s17_s11, %s17_s11 }
   0x3   :  { %p416_p0 = scmp.ne.s32.totalorder %s17_s11, %s415_s12  ;;  %p421_p2 = scmp.lt.s32.totalorder %s415_s12, %s415_s12 }
   0x5   :  { %p422_p3 = por %p421_p2, %p420_p1 }
   0x7   :  { %p423_p4 = pnand %p422_p3, %p416_p0 }
   0x9   :  { %426 = shalt.err (!%p423_p4)
}
   0xa   :  { %s429_s13 = smov [#allocation2]  }
   0xb   :  { %19 = dma.vmem_to_smem %s17_s11, 16, %s429_s13, [#allocation3]  }
   0xc   :  { %427 = dma.done.wait [#allocation3], 16  }
   0xd   :  { %428 = vsyncadd [#allocation3], 4294967280 }
   0xe   :  { %23 = sfence }
   0xf   :  { %v458_v0 = vld [vmem:[%s624_s0] sm:$0xff]  ;;  %v463_v1 = vld [vmem:[%s624_s0 + $0x10] sm:$0xff]  ;;  %vm84_vm0 = vcmask 1041408   ;;  %v80_v7 = vld [vmem:[%s624_s0 + $0x8] sm:$0x3]  ;;  %vm159_vm1 = vcmask 1041409  }
  0x10   :  { %v468_v2 = vld [vmem:[%s624_s0 + $0x20] sm:$0xff]  ;;  %v473_v3 = vld [vmem:[%s624_s0 + $0x30] sm:$0xff]  ;;  %v28_v4 = vrot.slane %v458_v0, 4  ;;  %v34_v5 = vrot.slane %v463_v1, 4  ;;  %v485_v9 = vld [vmem:[%s624_s0 + $0x18] sm:$0x3] }
  0x11   :  { %v40_v6 = vrot.slane %v468_v2, 4  ;;  %v46_v8 = vrot.slane %v473_v3, 4  ;;  %v490_v10 = vld [vmem:[%s624_s0 + $0x28] sm:$0x3]  ;;  %v117_v11 = vsel %vm84_vm0, %v80_v7, -inf  ;;  %v124_v18 = vsel %vm84_vm0, %v485_v9, -inf }
  0x12   :  { %v57_v12 = vmax.f32 %v458_v0, %v28_v4  ;;  %v63_v13 = vmax.f32 %v463_v1, %v34_v5  ;;  %v499_v15 = vld [vmem:[%s624_s0 + $0x38] sm:$0x3]  ;;  %v118_v16 = vrot.slane %v117_v11, 4  ;;  %v131_v19 = vsel %vm84_vm0, %v490_v10, -inf  ;;  %s430_s29 = smov 2   ;;  %s431_s30 = smov 3  }
  0x13   :  { %v69_v14 = vmax.f32 %v468_v2, %v40_v6  ;;  %v75_v17 = vmax.f32 %v473_v3, %v46_v8  ;;  %v138_v20 = vsel %vm84_vm0, %v499_v15, -inf  ;;  %v125_v26 = vrot.slane %v124_v18, 4  ;;  %s432_s3 = smov 1   ;;  %s394_s4 = sld [smem:[#allocation2 + $0x3]] }
  0x14   :  { %v58_v21 = vrot.slane %v57_v12, 2  ;;  %v64_v22 = vrot.slane %v63_v13, 2  ;;  %v119_v24 = vmax.f32 %v117_v11, %v118_v16  ;;  %v132_v27 = vrot.slane %v131_v19, 4  ;;  %s395_s5 = sld [smem:[#allocation2 + $0xa]]  ;;  %s433_s6 = smov 127  }
  0x15   :  { %v70_v23 = vrot.slane %v69_v14, 2  ;;  %v76_v25 = vrot.slane %v75_v17, 2  ;;  %v139_v28 = vrot.slane %v138_v20, 4  ;;  %v126_v34 = vmax.f32 %v124_v18, %v125_v26  ;;  %s434_s7 = smov 126   ;;  %s435_s8 = smov 125  }
  0x16   :  { %v59_v29 = vmax.f32 %v57_v12, %v58_v21  ;;  %v65_v30 = vmax.f32 %v63_v13, %v64_v22  ;;  %v120_v32 = vrot.slane %v119_v24, 2  ;;  %v133_v35 = vmax.f32 %v131_v19, %v132_v27  ;;  %s391_s9 = sld [smem:[#allocation2 + $0x8]] }
  0x17   :  { %v71_v31 = vmax.f32 %v69_v14, %v70_v23  ;;  %v77_v33 = vmax.f32 %v75_v17, %v76_v25  ;;  %v140_v36 = vmax.f32 %v138_v20, %v139_v28  ;;  %v127_v42 = vrot.slane %v126_v34, 2  ;;  %s389_s10 = sld [smem:[#allocation2 + $0x7]] }
  0x18   :  { %v60_v37 = vrot.slane %v59_v29, 1  ;;  %v66_v38 = vrot.slane %v65_v30, 1  ;;  %v121_v40 = vmax.f32 %v119_v24, %v120_v32  ;;  %v134_v43 = vrot.slane %v133_v35, 2  ;;  %s178_s11 = sld [smem:[#allocation2]] }
  0x19   :  { %v72_v39 = vrot.slane %v71_v31, 1  ;;  %v78_v41 = vrot.slane %v77_v33, 1  ;;  %v141_v44 = vrot.slane %v140_v36, 2  ;;  %v128_v48 = vmax.f32 %v126_v34, %v127_v42  ;;  %s390_s12 = sld [smem:[#allocation2 + $0x1]] }
  0x1a   :  { %v61_v45 = vmax.f32 %v59_v29, %v60_v37  ;;  %v122_v46 = vrot.slane %v121_v40, 1  ;;  %v67_v47 = vmax.f32 %v65_v30, %v66_v38  ;;  %v135_v49 = vmax.f32 %v133_v35, %v134_v43  ;;  %s560_s13 = sld [smem:[#allocation2 + $0x9]] }
  0x1b   :  { %v142_v50 = vmax.f32 %v140_v36, %v141_v44  ;;  %v73_v51 = vmax.f32 %v71_v31, %v72_v39  ;;  %v79_v52 = vmax.f32 %v77_v33, %v78_v41  ;;  %v29_v54 = vadd.f32 %v28_v4, %v458_v0  ;;  %s563_s14 = sld [smem:[#allocation2 + $0x2]] }
  0x1c   :  { %v123_v53 = vmax.f32 %v121_v40, %v122_v46  ;;  %v129_v55 = vrot.slane %v128_v48, 1  ;;  %v136_v56 = vrot.slane %v135_v49, 1  ;;  %v35_v58 = vadd.f32 %v34_v5, %v463_v1  ;;  %s565_s15 = sld [smem:[#allocation2 + $0xb]] }
  0x1d   :  { %v143_v57 = vrot.slane %v142_v50, 1  ;;  %v30_v60 = vrot.slane %v29_v54, 2  ;;  %v41_v61 = vadd.f32 %v40_v6, %v468_v2  ;;  %v47_v12 = vadd.f32 %v46_v8, %v473_v3  ;;  %s567_s16 = sld [smem:[#allocation2 + $0x4]] }
  0x1e   :  { %v510_v59 = vmax.f32 %v61_v45, %v123_v53  ;;  %v130_v62 = vmax.f32 %v128_v48, %v129_v55  ;;  %v137_v63 = vmax.f32 %v135_v49, %v136_v56  ;;  %vm161_vm2 = vcmask 1042434   ;;  %s570_s1 = sld [smem:[#allocation2 + $0xc]] }
  0x1f   :  { %v144_v11 = vmax.f32 %v142_v50, %v143_v57  ;;  %v85_v13 = vsel %vm84_vm0, %v80_v7, 0.0  ;;  %v36_v5 = vrot.slane %v35_v58, 2  ;;  %vm163_vm3 = vcmask 1043459   ;;  %s573_s17 = sld [smem:[#allocation2 + $0x5]] }
  0x20   :  { %v515_v4 = vmax.f32 %v67_v47, %v130_v62  ;;  %v517_v14 = vmax.f32 %v73_v51, %v137_v63  ;;  %v31_v17 = vadd.f32 %v30_v60, %v29_v54  ;;  %v42_v18 = vrot.slane %v41_v61, 2  ;;  %s576_s18 = sld [smem:[#allocation2 + $0xd]] }
  0x21   :  { %v519_v16 = vmax.f32 %v79_v52, %v144_v11  ;;  %v86_v6 = vrot.slane %v85_v13, 4  ;;  %v48_v8 = vrot.slane %v47_v12, 2  ;;  %v92_v20 = vsel %vm84_vm0, %v485_v9, 0.0  ;;  %s400_s19 = sld [smem:[#allocation2 + $0x6]] }
  0x22   :  { %v172_v19 = vsel %vm159_vm1, %v515_v4, %v510_v59  ;;  %v99_v7 = vsel %vm84_vm0, %v490_v10, 0.0  ;;  %v37_v23 = vadd.f32 %v36_v5, %v35_v58  ;;  %v93_v25 = vrot.slane %v92_v20, 4 }
  0x23   :  { %v173_v21 = vsel %vm161_vm2, %v517_v14, %v172_v19  ;;  %v87_v24 = vadd.f32 %v86_v6, %v85_v13  ;;  %v32_v9 = vrot.slane %v31_v17, 1  ;;  %v43_v10 = vadd.f32 %v42_v18, %v41_v61 }
  0x24   :  { %v532_v22 = vsel %vm163_vm3, %v519_v16, %v173_v21  ;;  %v100_v26 = vrot.slane %v99_v7, 4  ;;  %v106_v27 = vsel %vm84_vm0, %v499_v15, 0.0  ;;  %v49_v28 = vadd.f32 %v48_v8, %v47_v12 }
  0x25   :  { %195 = vrot.lane.b32.xlu1 %v532_v22, %s430_s29  ;;  %176 = vrot.lane.b32.xlu0 %v532_v22, %s431_s30  ;;  %v88_v29 = vrot.slane %v87_v24, 2  ;;  %v94_v30 = vadd.f32 %v93_v25, %v92_v20  ;;  %v107_v31 = vrot.slane %v106_v27, 4  ;;  %v38_v33 = vrot.slane %v37_v23, 1 }
  0x26   :  { %v101_v32 = vadd.f32 %v100_v26, %v99_v7  ;;  %v33_v37 = vadd.f32 %v32_v9, %v31_v17  ;;  %v44_v38 = vrot.slane %v43_v10, 1  ;;  %v50_v40 = vrot.slane %v49_v28, 1 }
  0x27   :  { %v89_v34 = vadd.f32 %v88_v29, %v87_v24  ;;  %v95_v35 = vrot.slane %v94_v30, 2  ;;  %v108_v36 = vadd.f32 %v107_v31, %v106_v27  ;;  %v39_v44 = vadd.f32 %v38_v33, %v37_v23 }
  0x28   :  { %v102_v39 = vrot.slane %v101_v32, 2  ;;  %v45_v48 = vadd.f32 %v44_v38, %v43_v10  ;;  %v51_v50 = vadd.f32 %v50_v40, %v49_v28  ;;  %v232_v55 = vstv %s394_s4 }
  0x29   :  { %214 = vrot.lane.b32.xlu1 %v532_v22, %s432_s3  ;;  %v90_v41 = vrot.slane %v89_v34, 1  ;;  %v96_v15 = vadd.f32 %v95_v35, %v94_v30  ;;  %v109_v42 = vrot.slane %v108_v36, 2  ;;  %v238_v61 = vstv %s395_s5 }
  0x2a   :  { %v103_v43 = vadd.f32 %v102_v39, %v101_v32  ;;  %v239_v12 = vmul.f32 %v238_v61, %v510_v59  ;;  %v240_v5 = vmul.f32 %v238_v61, %v515_v4  ;;  %v241_v17 = vmul.f32 %v238_v61, %v517_v14 }
  0x2b   :  { %v91_v45 = vadd.f32 %v90_v41, %v89_v34  ;;  %v97_v46 = vrot.slane %v96_v15, 1  ;;  %v110_v47 = vadd.f32 %v109_v42, %v108_v36  ;;  %v242_v18 = vmul.f32 %v238_v61, %v519_v16 }
  0x2c   :  { %v104_v49 = vrot.slane %v103_v43, 1  ;;  %v153_v26 = vlaneseq  ;;  %v201_v30 = vstv %s391_s9  ;;  %v179_v31 = vstv %s178_s11 }
  0x2d   :  { %v98_v51 = vadd.f32 %v97_v46, %v96_v15  ;;  %v111_v52 = vrot.slane %v110_v47, 1  ;;  %v113_v53 = vadd.f32 %v91_v45, %v33_v37  ;;  %v198_v33 = vstv %s390_s12 }
  0x2e   :  { %v105_v54 = vadd.f32 %v104_v49, %v103_v43  ;;  %v154_v29 = vand.u32 127, %v153_v26  ;;  %v220_v35 = vstv %s560_s13  ;;  %v217_v15 = vstv %s563_s14 }
  0x2f   :  { %v112_v56 = vadd.f32 %v111_v52, %v110_v47  ;;  %v114_v57 = vadd.f32 %v98_v51, %v39_v44  ;;  %v149_v58 = vmul.f32 0.1, %v113_v53  ;;  %v264_v46 = vstv %s565_s15 }
  0x30   :  { %v115_v60 = vadd.f32 %v105_v54, %v45_v48  ;;  %v185_v32 = vadd.s32 4294967293, %v154_v29  ;;  %v204_v34 = vadd.s32 4294967294, %v154_v29  ;;  %v223_v42 = vadd.s32 4294967295, %v154_v29 }
  0x31   :  { %v116_v62 = vadd.f32 %v112_v56, %v51_v50  ;;  %v150_v63 = vmul.f32 0.1, %v114_v57  ;;  %v233_v11 = vmul.f32 %v232_v55, %v149_v58  ;;  %v261_v53 = vstv %s567_s16 }
  0x32   :  { %v151_v13 = vmul.f32 0.1, %v115_v60  ;;  %vm186_vm4 = vcmp.ge.s32.totalorder %v185_v32, 0  ;;  %vm205_vm5 = vcmp.ge.s32.totalorder %v204_v34, 0  ;;  %vm224_vm6 = vcmp.ge.s32.totalorder %v223_v42, 0 }
  0x33   :  { %v152_v6 = vmul.f32 0.1, %v116_v62  ;;  %v160_v19 = vsel %vm159_vm1, %v150_v63, %v149_v58  ;;  %v234_v8 = vmul.f32 %v232_v55, %v150_v63  ;;  %v243_v20 = vadd.f32 %v239_v12, %v233_v11 }
  0x34   :  { %v162_v7 = vsel %vm161_vm2, %v151_v13, %v160_v19  ;;  %v235_v21 = vmul.f32 %v232_v55, %v151_v13  ;;  %v267_v56 = vadd.s32 1, %v154_v29  ;;  %v283_v58 = vstv %s570_s1 }
  0x35   :  { %v164_v23 = vsel %vm163_vm3, %v152_v6, %v162_v7  ;;  %v236_v24 = vmul.f32 %v232_v55, %v152_v6  ;;  %v244_v25 = vadd.f32 %v240_v5, %v234_v8  ;;  %v280_v11 = vstv %s573_s17 }
  0x36   :  { %166 = vrot.lane.b32.xlu0 %v164_v23, %s431_s30  ;;  %193 = vrot.lane.b32.xlu1 %v164_v23, %s430_s29  ;;  %v245_v59 = vadd.f32 %v241_v17, %v235_v21  ;;  %v286_v12 = vadd.s32 2, %v154_v29  ;;  %vm269_vm7 = vcmp.lt.s32.totalorder %v267_v56, 128  ;;  %v302_v6 = vstv %s576_s18 }
  0x37   :  { %v246_v4 = vadd.f32 %v242_v18, %v236_v24  ;;  %v251_v14 = vsel %vm159_vm1, %v244_v25, %v243_v20  ;;  %v299_v20 = vstv %s400_s19  ;;  %v305_v7 = vadd.s32 3, %v154_v29 }
  0x38   :  { %v252_v16 = vsel %vm161_vm2, %v245_v59, %v251_v14  ;;  %vm288_vm8 = vcmp.lt.s32.totalorder %v286_v12, 128  ;;  %v324_v29 = vshrl.u32 %v153_v26, 7  ;;  %v374_v26 = vld [vmem:[%s624_s0 + $0x28] sm:$0x3] }
  0x39   :  { %v554_v9 = vsel %vm163_vm3, %v246_v4, %v252_v16  ;;  %vm307_vm9 = vcmp.lt.s32.totalorder %v305_v7, 128 }
  0x3a   :  { %212 = vrot.lane.b32.xlu0 %v164_v23, %s432_s3  ;;  %258 = vrot.lane.b32.xlu1 %v532_v22, %s433_s6 }
  0x3e   :  { %256 = vrot.lane.b32.xlu0 %v164_v23, %s433_s6  ;;  %277 = vrot.lane.b32.xlu1 %v532_v22, %s434_s7 }
  0x42   :  { %275 = vrot.lane.b32.xlu0 %v164_v23, %s434_s7  ;;  %296 = vrot.lane.b32.xlu1 %v532_v22, %s435_s8  ;;  %v182_v22 = vstv %s389_s10 }
  0x46   :  { %294 = vrot.lane.b32.xlu0 %v164_v23, %s435_s8 }
  0x97   :  { %v196_v10 = vpop.permute.xlu1 %195  ;;  %v177_v27 = vpop.permute.xlu0 %176 }
  0x98   :  { %v202_v38 = vmul.f32 %v201_v30, %v196_v10  ;;  %v183_v39 = vmul.f32 %v182_v22, %v177_v27 }
  0x9b   :  { %v215_v28 = vpop.permute.xlu1 %214 }
  0x9c   :  { %v221_v48 = vmul.f32 %v220_v35, %v215_v28 }
  0xa8   :  { %v167_v36 = vpop.permute.xlu0 %166  ;;  %v194_v37 = vpop.permute.xlu1 %193 }
  0xa9   :  { %v180_v40 = vmul.f32 %v179_v31, %v167_v36  ;;  %v199_v41 = vmul.f32 %v198_v33, %v194_v37  ;;  %v436_v31 = vmov 1966171168   ;;  %v346_v36 = vsub.s32 0, %v324_v29 }
  0xaa   :  { %v321_v32 = vunpack.c.l.s4 %v436_v31 }
  0xab   :  { %v184_v43 = vadd.f32 %v183_v39, %v180_v40  ;;  %v203_v44 = vadd.f32 %v202_v38, %v199_v41  ;;  %v372_v40 = vld [vmem:[%s624_s0 + $0x8] sm:$0x3] }
  0xac   :  { %v213_v45 = vpop.permute.xlu0 %212  ;;  %v259_v47 = vpop.permute.xlu1 %258  ;;  %v322_v33 = vunpack.c.0.s8 %v321_v32 }
  0xad   :  { %v191_v49 = vsel %vm186_vm4, %v184_v43, 0.0  ;;  %v210_v50 = vsel %vm205_vm5, %v203_v44, 0.0  ;;  %v218_v51 = vmul.f32 %v217_v15, %v213_v45  ;;  %v265_v55 = vmul.f32 %v264_v46, %v259_v47  ;;  %v373_v43 = vld [vmem:[%s624_s0 + $0x18] sm:$0x3] }
  0xae   :  { %v211_v52 = vadd.f32 %v210_v50, %v191_v49  ;;  %v325_v34 = vsub.s32 %v322_v33, %v324_v29 }
  0xaf   :  { %v222_v54 = vadd.f32 %v221_v48, %v218_v51  ;;  %v375_v48 = vld [vmem:[%s624_s0 + $0x38] sm:$0x3] }
  0xb0   :  { %v257_v57 = vpop.permute.xlu0 %256  ;;  %v278_v60 = vpop.permute.xlu1 %277 }
  0xb1   :  { %v229_v61 = vsel %vm224_vm6, %v222_v54, 0.0  ;;  %v262_v62 = vmul.f32 %v261_v53, %v257_v57  ;;  %v284_v5 = vmul.f32 %v283_v58, %v278_v60 }
  0xb2   :  { %v230_v63 = vadd.f32 %v229_v61, %v211_v52 }
  0xb3   :  { %v266_v13 = vadd.f32 %v265_v55, %v262_v62 }
  0xb4   :  { %v255_v17 = vadd.f32 %v554_v9, %v230_v63  ;;  %v276_v18 = vpop.permute.xlu0 %275  ;;  %v297_v19 = vpop.permute.xlu1 %296 }
  0xb5   :  { %v281_v8 = vmul.f32 %v280_v11, %v276_v18  ;;  %v273_v21 = vsel %vm269_vm7, %v266_v13, 0.0  ;;  %v303_v24 = vmul.f32 %v302_v6, %v297_v19 }
  0xb6   :  { %v274_v25 = vadd.f32 %v273_v21, %v255_v17 }
  0xb7   :  { %v285_v23 = vadd.f32 %v284_v5, %v281_v8 }
  0xb8   :  { %v295_v59 = vpop.permute.xlu0 %294 }
  0xb9   :  { %v292_v4 = vsel %vm288_vm8, %v285_v23, 0.0  ;;  %v300_v14 = vmul.f32 %v299_v20, %v295_v59 }
  0xba   :  { %v293_v10 = vadd.f32 %v292_v4, %v274_v25 }
  0xbb   :  { %v304_v16 = vadd.f32 %v303_v24, %v300_v14 }
  0xbd   :  { %v311_v27 = vsel %vm307_vm9, %v304_v16, 0.0 }
  0xbe   :  { %v312_v9 = vadd.f32 %v311_v27, %v293_v10 }
  0xc0   :  { %v402_v28 = vmul.f32 -1.442695, %v312_v9 }
  0xc2   :  { %411 = vpow2.f32 %v402_v28 }
  0xcf   :  { %v412_v30 = vpop.eup %411 }
  0xd0   :  { %v316_v22 = vadd.f32 1.0, %v412_v30 }
  0xd2   :  { %413 = vrcp.f32 %v316_v22 }
  0xdf   :  { %v414_v35 = vpop.eup %413 }
  0xe0   :  { %v326_v37 = vrot.slane %v414_v35, %v325_v34 }
  0xe2   :  { %v327_v38 = vcombine.high %v326_v37, %v326_v37  ;;  %v334_v39 = vrot.slane %v326_v37, %v325_v34 }
  0xe4   :  { %v341_v41 = vrot.slane %v327_v38, %v325_v34  ;;  %v342_v15 = vcombine.high %v334_v39, %v334_v39  ;;  %v347_v42 = vrot.slane %v334_v39, %v346_v36 }
  0xe6   :  { %v343_v44 = vcombine.high %v341_v41, %v341_v41  ;;  %v351_v45 = vrot.slane %v341_v41, %v346_v36  ;;  %v355_v46 = vrot.slane %v342_v15, %v346_v36  ;;  %v364_v47 = vmul.f32 %v347_v42, %v458_v0 }
  0xe7   :  { %v376_v49 = vmul.f32 %v372_v40, %v347_v42 }
  0xe8   :  { %v359_v50 = vrot.slane %v343_v44, %v346_v36  ;;  %v365_v51 = vmul.f32 %v351_v45, %v463_v1  ;;  %v366_v52 = vmul.f32 %v355_v46, %v468_v2  ;;  %368 = vst [vmem:[%s626_s2] sm:$0xff] %v364_v47  ;;  %v377_v53 = vmul.f32 %v373_v43, %v351_v45 }
  0xe9   :  { %v378_v54 = vmul.f32 %v374_v26, %v355_v46  ;;  %380 = vst [vmem:[%s626_s2 + $0x8] sm:$0x3] %v376_v49 }
  0xea   :  { %v367_v0 = vmul.f32 %v359_v50, %v473_v3  ;;  %369 = vst [vmem:[%s626_s2 + $0x10] sm:$0xff] %v365_v51  ;;  %370 = vst [vmem:[%s626_s2 + $0x20] sm:$0xff] %v366_v52  ;;  %v379_v1 = vmul.f32 %v375_v48, %v359_v50 }
  0xeb   :  { %381 = vst [vmem:[%s626_s2 + $0x18] sm:$0x3] %v377_v53  ;;  %382 = vst [vmem:[%s626_s2 + $0x28] sm:$0x3] %v378_v54 }
  0xec   :  { %371 = vst [vmem:[%s626_s2 + $0x30] sm:$0xff] %v367_v0  ;;  %383 = vst [vmem:[%s626_s2 + $0x38] sm:$0x3] %v379_v1 }
  0xed   :  { %388 = vsyncpa [#allocation3], 1 }

</bundles_post_ra>
